<compile_context>
chip_gen: v6e
topology: v6e:2x2x1
jax: 0.10.0
libtpu: 0.0.40
codegen_flags: <defaults>
</compile_context>

<pallas_src>
import jax
import jax.numpy as jnp
from jax.experimental import pallas as pl
from jax.experimental.pallas import tpu as pltpu


def _round_up(v, m):
    return ((v + m - 1) // m) * m


def _cdiv(a, b):
    return -(-a // b)


def popdx_kernel(x_ref, w1_ref, b1_ref, w2_ref, b2_ref, yembt_ref, o_ref, z_ref):
    """One (batch-tile i, label-tile j) grid step.

    z only depends on the batch tile, so it is computed once per batch tile
    (j == 0) and cached in the bf16 VMEM scratch z_ref; every label tile then
    runs a single MXU pass z @ y_emb^T[:, tile_j].
    """
    j = pl.program_id(1)

    @pl.when(j == 0)
    def _():
        xb = x_ref[...].astype(w1_ref.dtype)
        # Linear 1: (TB, F) @ (F, H_p), f32 accumulation on the MXU.
        h = jnp.dot(xb, w1_ref[...], preferred_element_type=jnp.float32)
        h = h + b1_ref[...]                                   # bias in f32 (VPU)
        # Linear 2: (TB, H_p) @ (H_p, E_p).
        z = jnp.dot(h.astype(w2_ref.dtype), w2_ref[...],
                    preferred_element_type=jnp.float32)
        z = jnp.maximum(z + b2_ref[...], 0.0)                 # bias + ReLU in f32
        z_ref[...] = z.astype(z_ref.dtype)

    # Label-embedding projection: (TB, E_p) @ (E_p, TL) -> (TB, TL).
    o_ref[...] = jnp.dot(z_ref[...], yembt_ref[...],
                         preferred_element_type=jnp.float32).astype(o_ref.dtype)


def prepare_params(w1, b1, w2, b2, y_emb, *, compute_dtype=jnp.bfloat16):
    """One-time parameter prep (hoisted out of the per-call forward).

    Transposes weights to (in, out) layout, zero-pads only the MXU output dims
    H and E to multiples of 128 (exact math), and casts matmul operands to
    `compute_dtype`.  F and L stay unpadded; biases stay f32.
    """
    H, F = w1.shape
    E, Hm = w2.shape
    L, Em = y_emb.shape
    assert Hm == H and Em == E, "inconsistent parameter shapes"

    H_p = _round_up(H, 128)
    E_p = _round_up(E, 128)

    w1_t = jnp.zeros((F, H_p), compute_dtype).at[:, :H].set(
        jnp.transpose(w1).astype(compute_dtype))             # (F, H_p)
    w2_t = jnp.zeros((H_p, E_p), compute_dtype).at[:H, :E].set(
        jnp.transpose(w2).astype(compute_dtype))             # (H_p, E_p)
    yemb_t = jnp.zeros((E_p, L), compute_dtype).at[:E, :].set(
        jnp.transpose(y_emb).astype(compute_dtype))          # (E_p, L)
    b1_p = jnp.zeros((1, H_p), jnp.float32).at[:, :H].set(
        b1.astype(jnp.float32).reshape(1, -1))
    b2_p = jnp.zeros((1, E_p), jnp.float32).at[:, :E].set(
        b2.astype(jnp.float32).reshape(1, -1))

    dims = dict(F=F, H=H, E=E, L=L, H_p=H_p, E_p=E_p)
    return (w1_t, b1_p, w2_t, b2_p, yemb_t), dims


def _vmem_capacity_bytes():
    """Per-core VMEM capacity; conservative default if the query fails."""
    try:
        cap = getattr(pltpu.get_tpu_info(), "vmem_capacity_bytes", None)
        if cap:
            return int(cap)
    except Exception:
        pass
    return 64 * 1024 * 1024     # v7x per-TensorCore VMEM (smallest generation)


def _footprint_bytes(TB, TL, nl, F, H_p, E_p, x_itemsize, out_itemsize, w_bufs):
    """Estimated VMEM bytes for one pipelined kernel instance."""
    wt = 2  # bf16 weights / MXU operands
    weights = w_bufs * ((F * H_p + H_p * E_p) * wt + (H_p + E_p) * 4)
    yemb = (w_bufs if nl == 1 else 2) * E_p * TL * wt
    stream = 2 * TB * F * x_itemsize + 2 * TB * TL * out_itemsize
    z_cache = TB * E_p * wt                         # bf16 z scratch
    interm = TB * H_p * 4 + TB * E_p * 4            # f32 h / z materialized in VMEM
    return weights + yemb + stream + z_cache + interm


def _choose_tiles(B, L, F, H_p, E_p, x_itemsize, out_itemsize, vmem_cap):
    """Pick (batch tile, label tile) so the resident+streaming footprint fits."""
    budget = int(vmem_cap * 0.80)
    tb_target = 1024 if vmem_cap >= (96 << 20) else 512    # v5e/v6e vs v7x

    tb = min(tb_target, B)
    if 32 <= B <= tb_target:
        tb = _cdiv(B, 2)         # >=2 batch grid steps so v7x megacore splits
    tb = _round_up(tb, 16)       # bf16 sublane packing on the MXU LHS
    tb = min(tb, _round_up(B, 8))

    tl = L                       # label dim untiled by default

    def fp(tb_, tl_):
        return _footprint_bytes(tb_, tl_, _cdiv(L, tl_), F, H_p, E_p,
                                x_itemsize, out_itemsize, w_bufs=2)

    while fp(tb, tl) > budget and (tl > 128 or tb > 64):
        if tl > 128:
            tl = _round_up(_cdiv(tl, 2), 128)    # tile y_emb^T / output over L
        else:
            tb = max(64, _round_up(tb // 2, 16))
    # TODO(synk): if even (TB=64, TL=128) overflows the budget (huge F*H), W1
    # itself would need K-tiling over F; not implemented here.
    return tb, tl


def _build_forward(B, L, TB, TL, dims, out_dtype, vmem_limit,
                   single_buffer_weights):
    F, H_p, E_p = dims["F"], dims["H_p"], dims["E_p"]
    nb, nl = _cdiv(B, TB), _cdiv(L, TL)

    def const_spec(shape):
        # Constant-index (weight-stationary) block: one VMEM buffer suffices.
        if single_buffer_weights:
            return pl.BlockSpec(shape, lambda i, j: (0, 0),
                                pipeline_mode=pl.Buffered(1))
        return pl.BlockSpec(shape, lambda i, j: (0, 0))

    if nl == 1:
        yemb_spec = const_spec((E_p, TL))
    else:
        yemb_spec = pl.BlockSpec((E_p, TL), lambda i, j: (0, j))

    return pl.pallas_call(
        popdx_kernel,
        out_shape=jax.ShapeDtypeStruct((B, L), out_dtype),
        grid_spec=pltpu.PrefetchScalarGridSpec(
            num_scalar_prefetch=0,
            grid=(nb, nl),
            in_specs=[
                pl.BlockSpec((TB, F), lambda i, j: (i, 0)),   # x streams per tile
                const_spec((F, H_p)),                         # W1 (VMEM-resident)
                const_spec((1, H_p)),                         # b1
                const_spec((H_p, E_p)),                       # W2
                const_spec((1, E_p)),                         # b2
                yemb_spec,                                     # y_emb^T
            ],
            out_specs=pl.BlockSpec((TB, TL), lambda i, j: (i, j)),
            scratch_shapes=[pltpu.VMEM((TB, E_p), jnp.bfloat16)],  # cached z
        ),
        compiler_params=pltpu.CompilerParams(
            dimension_semantics=("parallel", "arbitrary"),  # batch split on v7x
            vmem_limit_bytes=vmem_limit,
        ),
    )


def popdx_forward(x, params, dims, *, out_dtype=jnp.float32):
    """x: (B, feature_num) float; params/dims from prepare_params."""
    w1_t, b1_p, w2_t, b2_p, yemb_t = params
    F, L, H_p, E_p = dims["F"], dims["L"], dims["H_p"], dims["E_p"]
    B = x.shape[0]
    assert x.shape[1] == F, "feature dim mismatch"

    x_itemsize = jnp.dtype(x.dtype).itemsize
    out_itemsize = jnp.dtype(out_dtype).itemsize

    vmem_cap = _vmem_capacity_bytes()
    TB, TL = _choose_tiles(B, L, F, H_p, E_p, x_itemsize, out_itemsize, vmem_cap)

    # Declared limit: conservative footprint (double-buffered weights, so the
    # no-pipeline_mode fallback also fits) + headroom, capped below physical.
    fp = _footprint_bytes(TB, TL, _cdiv(L, TL), F, H_p, E_p,
                          x_itemsize, out_itemsize, w_bufs=2)
    vmem_limit = int(min(vmem_cap * 0.9,
                         max(int(fp * 1.25), 32 * 1024 * 1024)))

    args = (x, w1_t, b1_p, w2_t, b2_p, yemb_t)
    try:
        call = _build_forward(B, L, TB, TL, dims, out_dtype, vmem_limit,
                              single_buffer_weights=True)
        out = call(*args)
        jax.block_until_ready(out)   # surface any lowering/runtime issue here
        return out
    except Exception:
        # Fallback if this Pallas version rejects pipeline_mode=pl.Buffered(1).
        call = _build_forward(B, L, TB, TL, dims, out_dtype, vmem_limit,
                              single_buffer_weights=False)
        return call(*args)


if __name__ == "__main__":
    # Small shapes consistent with the module.
    batch = 8
    feature_num = 32
    hidden_size = 64
    label_num = 24
    emb_dim = 16          # y_emb.shape[1]

    key = jax.random.PRNGKey(0)
    kx, kw1, kb1, kw2, kb2, ky = jax.random.split(key, 6)

    x = jax.random.normal(kx, (batch, feature_num), dtype=jnp.float32)

    # Deterministic parameter init (kaiming-normal-style, as in initialize()).
    w1 = jax.random.normal(kw1, (hidden_size, feature_num), dtype=jnp.float32) * jnp.sqrt(
        2.0 / feature_num)
    b1 = jax.random.normal(kb1, (hidden_size,), dtype=jnp.float32) * 0.01
    w2 = jax.random.normal(kw2, (emb_dim, hidden_size), dtype=jnp.float32) * jnp.sqrt(
        2.0 / hidden_size)
    b2 = jax.random.normal(kb2, (emb_dim,), dtype=jnp.float32) * 0.01
    y_emb = jax.random.normal(ky, (label_num, emb_dim), dtype=jnp.float32)

    # One-time parameter prep (bf16 operands, f32 accumulation in kernel).
    params, dims = prepare_params(w1, b1, w2, b2, y_emb, compute_dtype=jnp.bfloat16)

    out = popdx_forward(x, params, dims)
    out = jax.block_until_ready(out)
    assert out.shape == (batch, label_num)

    # Precision-matched pure-JAX reference (same bf16 operands, f32 accumulation).
    xb = x.astype(jnp.bfloat16)
    w1b = w1.astype(jnp.bfloat16)
    w2b = w2.astype(jnp.bfloat16)
    yb = y_emb.astype(jnp.bfloat16)
    h_ref = jnp.dot(xb, w1b.T, preferred_element_type=jnp.float32) + b1
    z_ref = jnp.dot(h_ref.astype(jnp.bfloat16), w2b.T,
                    preferred_element_type=jnp.float32) + b2
    z_ref = jnp.maximum(z_ref, 0.0)
    ref = jnp.dot(z_ref.astype(jnp.bfloat16), yb.T,
                  preferred_element_type=jnp.float32)

    assert jnp.allclose(out, ref, atol=1e-2, rtol=1e-2), (
        float(jnp.max(jnp.abs(out - ref))))

    print("KERNEL_OK")
</pallas_src>

<mosaic_0001>
module attributes {stable_mosaic.version = 11 : i64} {
  func.func @popdx_kernel(%arg0: i32, %arg1: i32, %arg2: memref<8x32xf32, #tpu.memory_space<vmem>>, %arg3: memref<32x128xbf16, #tpu.memory_space<vmem>>, %arg4: memref<1x128xf32, #tpu.memory_space<vmem>>, %arg5: memref<128x128xbf16, #tpu.memory_space<vmem>>, %arg6: memref<1x128xf32, #tpu.memory_space<vmem>>, %arg7: memref<128x24xbf16, #tpu.memory_space<vmem>>, %arg8: memref<8x24xf32, #tpu.memory_space<vmem>>, %arg9: memref<8x128xbf16, #tpu.memory_space<vmem>>) attributes {dimension_semantics = [#tpu.dimension_semantics<parallel>, #tpu.dimension_semantics<arbitrary>], iteration_bounds = array<i64: 1, 1>, scalar_prefetch = 0 : i64, scratch_operands = 1 : i64, tpu.core_type = #tpu.core_type<tc>, window_params = [{transform_indices = @transform_0, window_bounds = array<i64: 8, 32>}, {pipeline_mode = #tpu.pipeline_mode<synchronous>, transform_indices = @transform_1, window_bounds = array<i64: 32, 128>}, {pipeline_mode = #tpu.pipeline_mode<synchronous>, transform_indices = @transform_2, window_bounds = array<i64: 1, 128>}, {pipeline_mode = #tpu.pipeline_mode<synchronous>, transform_indices = @transform_3, window_bounds = array<i64: 128, 128>}, {pipeline_mode = #tpu.pipeline_mode<synchronous>, transform_indices = @transform_4, window_bounds = array<i64: 1, 128>}, {pipeline_mode = #tpu.pipeline_mode<synchronous>, transform_indices = @transform_5, window_bounds = array<i64: 128, 24>}, {transform_indices = @transform_6, window_bounds = array<i64: 8, 24>}]} {
    %c0_i32 = arith.constant 0 : i32
    %0 = arith.cmpi eq, %arg1, %c0_i32 : i32
    %1 = arith.extui %0 : i1 to i32
    %c0_i32_0 = arith.constant 0 : i32
    %2 = arith.cmpi ne, %1, %c0_i32_0 : i32
    scf.if %2 {
      %c0_6 = arith.constant 0 : index
      %c0_7 = arith.constant 0 : index
      %7 = vector.load %arg2[%c0_6, %c0_7] : memref<8x32xf32, #tpu.memory_space<vmem>>, vector<8x32xf32>
      %8 = arith.truncf %7 : vector<8x32xf32> to vector<8x32xbf16>
      %c0_8 = arith.constant 0 : index
      %c0_9 = arith.constant 0 : index
      %9 = vector.load %arg3[%c0_8, %c0_9] : memref<32x128xbf16, #tpu.memory_space<vmem>>, vector<32x128xbf16>
      %cst_10 = arith.constant dense<0.000000e+00> : vector<8x128xf32>
      %10 = tpu.matmul %8, %9, %cst_10 {dimension_numbers = #tpu.dot_dimension_numbers<[1], [0], [0], [1], [0, 0, 1, 1], [], []>} : vector<8x32xbf16>, vector<32x128xbf16>, vector<8x128xf32> -> vector<8x128xf32>
      %c0_11 = arith.constant 0 : index
      %c0_12 = arith.constant 0 : index
      %11 = vector.load %arg4[%c0_11, %c0_12] : memref<1x128xf32, #tpu.memory_space<vmem>>, vector<1x128xf32>
      %12 = vector.broadcast %11 : vector<1x128xf32> to vector<8x128xf32>
      %13 = arith.addf %10, %12 : vector<8x128xf32>
      %14 = arith.truncf %13 : vector<8x128xf32> to vector<8x128xbf16>
      %c0_13 = arith.constant 0 : index
      %c0_14 = arith.constant 0 : index
      %15 = vector.load %arg5[%c0_13, %c0_14] : memref<128x128xbf16, #tpu.memory_space<vmem>>, vector<128x128xbf16>
      %cst_15 = arith.constant dense<0.000000e+00> : vector<8x128xf32>
      %16 = tpu.matmul %14, %15, %cst_15 {dimension_numbers = #tpu.dot_dimension_numbers<[1], [0], [0], [1], [0, 0, 1, 1], [], []>} : vector<8x128xbf16>, vector<128x128xbf16>, vector<8x128xf32> -> vector<8x128xf32>
      %c0_16 = arith.constant 0 : index
      %c0_17 = arith.constant 0 : index
      %17 = vector.load %arg6[%c0_16, %c0_17] : memref<1x128xf32, #tpu.memory_space<vmem>>, vector<1x128xf32>
      %18 = vector.broadcast %17 : vector<1x128xf32> to vector<8x128xf32>
      %19 = arith.addf %16, %18 : vector<8x128xf32>
      %cst_18 = arith.constant 0.000000e+00 : f32
      %20 = vector.broadcast %cst_18 : f32 to vector<8x128xf32>
      %21 = arith.maximumf %19, %20 : vector<8x128xf32>
      %22 = arith.truncf %21 : vector<8x128xf32> to vector<8x128xbf16>
      %c0_19 = arith.constant 0 : index
      %c0_20 = arith.constant 0 : index
      %23 = vector.load %arg9[%c0_19, %c0_20] : memref<8x128xbf16, #tpu.memory_space<vmem>>, vector<8x128xbf16>
      tpu.vector_store %arg9[%c0_19, %c0_20], %22 {strides = array<i32>} : memref<8x128xbf16, #tpu.memory_space<vmem>>, vector<8x128xbf16>,
    } else {
    }
    %c0 = arith.constant 0 : index
    %c0_1 = arith.constant 0 : index
    %3 = vector.load %arg9[%c0, %c0_1] : memref<8x128xbf16, #tpu.memory_space<vmem>>, vector<8x128xbf16>
    %c0_2 = arith.constant 0 : index
    %c0_3 = arith.constant 0 : index
    %4 = vector.load %arg7[%c0_2, %c0_3] : memref<128x24xbf16, #tpu.memory_space<vmem>>, vector<128x24xbf16>
    %cst = arith.constant dense<0.000000e+00> : vector<8x24xf32>
    %5 = tpu.matmul %3, %4, %cst {dimension_numbers = #tpu.dot_dimension_numbers<[1], [0], [0], [1], [0, 0, 1, 1], [], []>} : vector<8x128xbf16>, vector<128x24xbf16>, vector<8x24xf32> -> vector<8x24xf32>
    %c0_4 = arith.constant 0 : index
    %c0_5 = arith.constant 0 : index
    %6 = vector.load %arg8[%c0_4, %c0_5] : memref<8x24xf32, #tpu.memory_space<vmem>>, vector<8x24xf32>
    tpu.vector_store %arg8[%c0_4, %c0_5], %5 {strides = array<i32>} : memref<8x24xf32, #tpu.memory_space<vmem>>, vector<8x24xf32>,
    return
  }
  func.func @transform_0(%arg0: i32, %arg1: i32) -> (i32, i32) {
    %c0_i32 = arith.constant 0 : i32
    %c0_i32_0 = arith.constant 0 : i32
    return %arg0, %c0_i32 : i32, i32
  }
  func.func @transform_1(%arg0: i32, %arg1: i32) -> (i32, i32) {
    %c0_i32 = arith.constant 0 : i32
    %c0_i32_0 = arith.constant 0 : i32
    %c0_i32_1 = arith.constant 0 : i32
    return %c0_i32, %c0_i32_0 : i32, i32
  }
  func.func @transform_2(%arg0: i32, %arg1: i32) -> (i32, i32) {
    %c0_i32 = arith.constant 0 : i32
    %c0_i32_0 = arith.constant 0 : i32
    %c0_i32_1 = arith.constant 0 : i32
    return %c0_i32, %c0_i32_0 : i32, i32
  }
  func.func @transform_3(%arg0: i32, %arg1: i32) -> (i32, i32) {
    %c0_i32 = arith.constant 0 : i32
    %c0_i32_0 = arith.constant 0 : i32
    %c0_i32_1 = arith.constant 0 : i32
    return %c0_i32, %c0_i32_0 : i32, i32
  }
  func.func @transform_4(%arg0: i32, %arg1: i32) -> (i32, i32) {
    %c0_i32 = arith.constant 0 : i32
    %c0_i32_0 = arith.constant 0 : i32
    %c0_i32_1 = arith.constant 0 : i32
    return %c0_i32, %c0_i32_0 : i32, i32
  }
  func.func @transform_5(%arg0: i32, %arg1: i32) -> (i32, i32) {
    %c0_i32 = arith.constant 0 : i32
    %c0_i32_0 = arith.constant 0 : i32
    %c0_i32_1 = arith.constant 0 : i32
    return %c0_i32, %c0_i32_0 : i32, i32
  }
  func.func @transform_6(%arg0: i32, %arg1: i32) -> (i32, i32) {
    %c0_i32 = arith.constant 0 : i32
    return %arg0, %arg1 : i32, i32
  }
}

module attributes {stable_mosaic.version = 11 : i64} {
  func.func @popdx_kernel(%arg0: i32, %arg1: i32, %arg2: memref<8x32xf32, #tpu.memory_space<vmem>>, %arg3: memref<32x128xbf16, #tpu.memory_space<vmem>>, %arg4: memref<1x128xf32, #tpu.memory_space<vmem>>, %arg5: memref<128x128xbf16, #tpu.memory_space<vmem>>, %arg6: memref<1x128xf32, #tpu.memory_space<vmem>>, %arg7: memref<128x24xbf16, #tpu.memory_space<vmem>>, %arg8: memref<8x24xf32, #tpu.memory_space<vmem>>, %arg9: memref<8x128xbf16, #tpu.memory_space<vmem>>) attributes {dimension_semantics = [#tpu.dimension_semantics<parallel>, #tpu.dimension_semantics<arbitrary>], iteration_bounds = array<i64: 1, 1>, scalar_prefetch = 0 : i64, scratch_operands = 1 : i64, tpu.core_type = #tpu.core_type<tc>, window_params = [{transform_indices = @transform_0, window_bounds = array<i64: 8, 32>}, {pipeline_mode = #tpu.pipeline_mode<synchronous>, transform_indices = @transform_1, window_bounds = array<i64: 32, 128>}, {pipeline_mode = #tpu.pipeline_mode<synchronous>, transform_indices = @transform_2, window_bounds = array<i64: 1, 128>}, {pipeline_mode = #tpu.pipeline_mode<synchronous>, transform_indices = @transform_3, window_bounds = array<i64: 128, 128>}, {pipeline_mode = #tpu.pipeline_mode<synchronous>, transform_indices = @transform_4, window_bounds = array<i64: 1, 128>}, {pipeline_mode = #tpu.pipeline_mode<synchronous>, transform_indices = @transform_5, window_bounds = array<i64: 128, 24>}, {transform_indices = @transform_6, window_bounds = array<i64: 8, 24>}]} {
    %c0_i32 = arith.constant 0 : i32
    %0 = arith.cmpi eq, %arg1, %c0_i32 : i32
    %1 = arith.extui %0 : i1 to i32
    %c0_i32_0 = arith.constant 0 : i32
    %2 = arith.cmpi ne, %1, %c0_i32_0 : i32
    scf.if %2 {
      %c0_6 = arith.constant 0 : index
      %c0_7 = arith.constant 0 : index
      %7 = vector.load %arg2[%c0_6, %c0_7] : memref<8x32xf32, #tpu.memory_space<vmem>>, vector<8x32xf32>
      %8 = arith.truncf %7 : vector<8x32xf32> to vector<8x32xbf16>
      %c0_8 = arith.constant 0 : index
      %c0_9 = arith.constant 0 : index
      %9 = vector.load %arg3[%c0_8, %c0_9] : memref<32x128xbf16, #tpu.memory_space<vmem>>, vector<32x128xbf16>
      %cst_10 = arith.constant dense<0.000000e+00> : vector<8x128xf32>
      %10 = tpu.matmul %8, %9, %cst_10 {dimension_numbers = #tpu.dot_dimension_numbers<[1], [0], [0], [1], [0, 0, 1, 1], [], []>} : vector<8x32xbf16>, vector<32x128xbf16>, vector<8x128xf32> -> vector<8x128xf32>
      %c0_11 = arith.constant 0 : index
      %c0_12 = arith.constant 0 : index
      %11 = vector.load %arg4[%c0_11, %c0_12] : memref<1x128xf32, #tpu.memory_space<vmem>>, vector<1x128xf32>
      %12 = vector.broadcast %11 : vector<1x128xf32> to vector<8x128xf32>
      %13 = arith.addf %10, %12 : vector<8x128xf32>
      %14 = arith.truncf %13 : vector<8x128xf32> to vector<8x128xbf16>
      %c0_13 = arith.constant 0 : index
      %c0_14 = arith.constant 0 : index
      %15 = vector.load %arg5[%c0_13, %c0_14] : memref<128x128xbf16, #tpu.memory_space<vmem>>, vector<128x128xbf16>
      %cst_15 = arith.constant dense<0.000000e+00> : vector<8x128xf32>
      %16 = tpu.matmul %14, %15, %cst_15 {dimension_numbers = #tpu.dot_dimension_numbers<[1], [0], [0], [1], [0, 0, 1, 1], [], []>} : vector<8x128xbf16>, vector<128x128xbf16>, vector<8x128xf32> -> vector<8x128xf32>
      %c0_16 = arith.constant 0 : index
      %c0_17 = arith.constant 0 : index
      %17 = vector.load %arg6[%c0_16, %c0_17] : memref<1x128xf32, #tpu.memory_space<vmem>>, vector<1x128xf32>
      %18 = vector.broadcast %17 : vector<1x128xf32> to vector<8x128xf32>
      %19 = arith.addf %16, %18 : vector<8x128xf32>
      %cst_18 = arith.constant 0.000000e+00 : f32
      %20 = vector.broadcast %cst_18 : f32 to vector<8x128xf32>
      %21 = arith.maximumf %19, %20 : vector<8x128xf32>
      %22 = arith.truncf %21 : vector<8x128xf32> to vector<8x128xbf16>
      %c0_19 = arith.constant 0 : index
      %c0_20 = arith.constant 0 : index
      %23 = vector.load %arg9[%c0_19, %c0_20] : memref<8x128xbf16, #tpu.memory_space<vmem>>, vector<8x128xbf16>
      tpu.vector_store %arg9[%c0_19, %c0_20], %22 {strides = array<i32>} : memref<8x128xbf16, #tpu.memory_space<vmem>>, vector<8x128xbf16>,
    } else {
    }
    %c0 = arith.constant 0 : index
    %c0_1 = arith.constant 0 : index
    %3 = vector.load %arg9[%c0, %c0_1] : memref<8x128xbf16, #tpu.memory_space<vmem>>, vector<8x128xbf16>
    %c0_2 = arith.constant 0 : index
    %c0_3 = arith.constant 0 : index
    %4 = vector.load %arg7[%c0_2, %c0_3] : memref<128x24xbf16, #tpu.memory_space<vmem>>, vector<128x24xbf16>
    %cst = arith.constant dense<0.000000e+00> : vector<8x24xf32>
    %5 = tpu.matmul %3, %4, %cst {dimension_numbers = #tpu.dot_dimension_numbers<[1], [0], [0], [1], [0, 0, 1, 1], [], []>} : vector<8x128xbf16>, vector<128x24xbf16>, vector<8x24xf32> -> vector<8x24xf32>
    %c0_4 = arith.constant 0 : index
    %c0_5 = arith.constant 0 : index
    %6 = vector.load %arg8[%c0_4, %c0_5] : memref<8x24xf32, #tpu.memory_space<vmem>>, vector<8x24xf32>
    tpu.vector_store %arg8[%c0_4, %c0_5], %5 {strides = array<i32>} : memref<8x24xf32, #tpu.memory_space<vmem>>, vector<8x24xf32>,
    return
  }
  func.func @transform_0(%arg0: i32, %arg1: i32) -> (i32, i32) {
    %c0_i32 = arith.constant 0 : i32
    %c0_i32_0 = arith.constant 0 : i32
    return %arg0, %c0_i32 : i32, i32
  }
  func.func @transform_1(%arg0: i32, %arg1: i32) -> (i32, i32) {
    %c0_i32 = arith.constant 0 : i32
    %c0_i32_0 = arith.constant 0 : i32
    %c0_i32_1 = arith.constant 0 : i32
    return %c0_i32, %c0_i32_0 : i32, i32
  }
  func.func @transform_2(%arg0: i32, %arg1: i32) -> (i32, i32) {
    %c0_i32 = arith.constant 0 : i32
    %c0_i32_0 = arith.constant 0 : i32
    %c0_i32_1 = arith.constant 0 : i32
    return %c0_i32, %c0_i32_0 : i32, i32
  }
  func.func @transform_3(%arg0: i32, %arg1: i32) -> (i32, i32) {
    %c0_i32 = arith.constant 0 : i32
    %c0_i32_0 = arith.constant 0 : i32
    %c0_i32_1 = arith.constant 0 : i32
    return %c0_i32, %c0_i32_0 : i32, i32
  }
  func.func @transform_4(%arg0: i32, %arg1: i32) -> (i32, i32) {
    %c0_i32 = arith.constant 0 : i32
    %c0_i32_0 = arith.constant 0 : i32
    %c0_i32_1 = arith.constant 0 : i32
    return %c0_i32, %c0_i32_0 : i32, i32
  }
  func.func @transform_5(%arg0: i32, %arg1: i32) -> (i32, i32) {
    %c0_i32 = arith.constant 0 : i32
    %c0_i32_0 = arith.constant 0 : i32
    %c0_i32_1 = arith.constant 0 : i32
    return %c0_i32, %c0_i32_0 : i32, i32
  }
  func.func @transform_6(%arg0: i32, %arg1: i32) -> (i32, i32) {
    %c0_i32 = arith.constant 0 : i32
    return %arg0, %arg1 : i32, i32
  }
}

</mosaic_0001>

<bundles_post_ra>
// kernel: tpu_custom_call.1
= control target key start
LH: loop header
LB: loop body
LE: loop exit
PB: predicated region body
PF: predicated region fallthrough
CT: control target
= control target key end

     0   :  { %11 = vsyncpa [#allocation4], 0  ;;  %s632_s0 = inlined_call_operand.hbm [shape: f32[8,32], index: 0, kind: input, shape index: {}]   ;;  %s633_s1 = inlined_call_operand.vmem [shape: bf16[32,128], index: 1, kind: input, shape index: {}]   ;;  %s634_s2 = inlined_call_operand.vmem [shape: f32[1,128], index: 2, kind: input, shape index: {}]   ;;  %s635_s3 = inlined_call_operand.vmem [shape: bf16[128,128], index: 3, kind: input, shape index: {}]   ;;  %s636_s4 = inlined_call_operand.vmem [shape: f32[1,128], index: 4, kind: input, shape index: {}]   ;;  %s637_s5 = inlined_call_operand.vmem [shape: bf16[128,24], index: 5, kind: input, shape index: {}]   ;;  %s638_s6 = inlined_call_operand.hbm [shape: f32[8,24], index: 6, kind: output, shape index: {}]  }
   0x1   :  { %12 = vsyncpa [#allocation5], 0  ;;  %s503_s21 = smov [#allocation3]  }
   0x2   :  { %s19_s22 = sshll.u32 %s503_s21, 4  ;;  %s20_s22 = int_to_ptr.vmem [resolvable:$true] %s19_s22 }
   0x3   :  { %s467_s23 = scalar_lea.vmem %s20_s22, 128  ;;  %p472_p1 = scmp.lt.s32.totalorder %s20_s22, %s20_s22 }
   0x4   :  { %p468_p0 = scmp.ne.s32.totalorder %s20_s22, %s467_s23  ;;  %p473_p2 = scmp.lt.s32.totalorder %s467_s23, %s467_s23 }
   0x6   :  { %p474_p3 = por %p473_p2, %p472_p1 }
   0x8   :  { %p475_p4 = pnand %p474_p3, %p468_p0 }
   0xa   :  { %478 = shalt.err (!%p475_p4)
}
   0xb   :  { %22 = dma.hbm_to_vmem [thread:$0]  %s632_s0, 128, %s20_s22, [#allocation4]  }
   0xc   :  { %499 = dma.done.wait [#allocation4], 128  }
   0xd   :  { %500 = vsyncadd [#allocation4], 4294967168  ;;  %v504_v0 = vmov 0.0   ;;  %vm505_vm0 = vmmov 0   ;;  %v441_v1 = vld [vmem:[%s633_s1 + $0x8] sm:$0xff]   ;;  %v442_v2 = vld [vmem:[%s633_s1] sm:$0xff]  }
   0xe   :  { %389 = vmatprep.subr.bf16.mxu0 %v504_v0  ;;  %393 = vmatprep.mubr.msk.bf16.mxu0 %vm505_vm0, %v504_v0  ;;  %v41_v3 = vld [vmem:[#allocation3] sm:$0xff]  ;;  %v443_v4 = vld [vmem:[%s635_s3 + $0x38] sm:$0xff]   ;;  %v444_v6 = vld [vmem:[%s635_s3 + $0x30] sm:$0xff]   ;;  %vm66_vm1 = vcmask 261120   ;;  %s506_s12 = smov [#allocation6]   ;;  %vm330_vm2 = vcmask 195584  }
   0xf   :  { %397 = vmatprep.subr.bf16.mxu1 %v504_v0  ;;  %413 = vmatprep.mubr.msk.bf16.mxu1 %vm505_vm0, %v504_v0  ;;  %v42_v5 = vpack.c.bf16 %v41_v3, %v41_v3  ;;  %v445_v7 = vld [vmem:[%s635_s3 + $0x28] sm:$0xff]   ;;  %v446_v8 = vld [vmem:[%s635_s3 + $0x20] sm:$0xff]   ;;  %v447_v9 = vld [vmem:[%s635_s3 + $0x18] sm:$0xff]   ;;  %s338_s13 = sshll.u32 %s506_s12, 4  ;;  %s339_s13 = int_to_ptr.vmem [resolvable:$true] %s338_s13 }
  0x10   :  { %390 = vmatpush3.bf16.msra.mxu0 %v441_v1  ;;  %398 = vmatpush3.bf16.msra.mxu1 %v443_v4  ;;  %v448_v10 = vld [vmem:[%s635_s3 + $0x10] sm:$0xff]   ;;  %v449_v11 = vld [vmem:[%s635_s3 + $0x8] sm:$0xff]   ;;  %v450_v12 = vld [vmem:[%s635_s3] sm:$0xff]   ;;  %p484_p6 = scmp.lt.s32.totalorder %s339_s13, %s339_s13 }
  0x11   :  { %391 = vmatprep.subr.bf16.mxu0 %v504_v0  ;;  %399 = vmatprep.subr.bf16.mxu1 %v504_v0  ;;  %v451_v13 = vld [vmem:[%s637_s5 + $0x38] sm:$0xff]   ;;  %v452_v14 = vld [vmem:[%s637_s5 + $0x30] sm:$0xff]   ;;  %v453_v15 = vld [vmem:[%s637_s5 + $0x28] sm:$0xff]  }
  0x12   :  { %v454_v16 = vld [vmem:[%s637_s5 + $0x20] sm:$0xff]   ;;  %v455_v24 = vld [vmem:[%s637_s5 + $0x18] sm:$0xff]   ;;  %v456_v25 = vld [vmem:[%s637_s5 + $0x10] sm:$0xff]  }
  0x13   :  { %v347_v17 = vld [vmem:[%s634_s2] ss:$0 sm:$0xff]  ;;  %v457_v26 = vld [vmem:[%s637_s5 + $0x8] sm:$0xff]  }
  0x14   :  { %392 = vmatpush3.bf16.msra.mxu0 %v442_v2  ;;  %400 = vmatpush3.bf16.msra.mxu1 %v444_v6  ;;  %v458_v27 = vld [vmem:[%s637_s5] sm:$0xff]   ;;  %s479_s5 = scalar_lea.vmem %s339_s13, 128 }
  0x15   :  { %417 = vmatprep.subr.bf16.mxu0 %v504_v0  ;;  %401 = vmatprep.subr.bf16.mxu1 %v504_v0  ;;  %v351_v28 = vld [vmem:[%s636_s4] ss:$0 sm:$0xff]  ;;  %p480_p5 = scmp.ne.s32.totalorder %s339_s13, %s479_s5  ;;  %p485_p7 = scmp.lt.s32.totalorder %s479_s5, %s479_s5 }
  0x17   :  { %394 = vmatmul.mubr.msk.bf16.vlgmr.msra.gmra.mxu0 %vm66_vm1, %v42_v5  ;;  %p486_p8 = por %p485_p7, %p484_p6 }
  0x18   :  { %433 = vmatprep.mubr.msk.bf16.mxu0 %vm505_vm0, %v504_v0  ;;  %402 = vmatpush3.bf16.msra.mxu1 %v445_v7 }
  0x19   :  { %403 = vmatprep.subr.bf16.mxu1 %v504_v0  ;;  %418 = vmatpush3.bf16.msra.mxu0 %v451_v13  ;;  %p487_p9 = pnand %p486_p8, %p480_p5 }
  0x1a   :  { %419 = vmatprep.subr.bf16.mxu0 %v504_v0 }
  0x1c   :  { %404 = vmatpush3.bf16.msra.mxu1 %v446_v8 }
  0x1d   :  { %405 = vmatprep.subr.bf16.mxu1 %v504_v0  ;;  %420 = vmatpush3.bf16.msra.mxu0 %v452_v14 }
  0x1e   :  { %421 = vmatprep.subr.bf16.mxu0 %v504_v0 }
  0x20   :  { %406 = vmatpush3.bf16.msra.mxu1 %v447_v9 }
  0x21   :  { %407 = vmatprep.subr.bf16.mxu1 %v504_v0  ;;  %422 = vmatpush3.bf16.msra.mxu0 %v453_v15 }
  0x22   :  { %423 = vmatprep.subr.bf16.mxu0 %v504_v0 }
  0x24   :  { %408 = vmatpush3.bf16.msra.mxu1 %v448_v10 }
  0x25   :  { %409 = vmatprep.subr.bf16.mxu1 %v504_v0  ;;  %424 = vmatpush3.bf16.msra.mxu0 %v454_v16 }
  0x26   :  { %425 = vmatprep.subr.bf16.mxu0 %v504_v0 }
  0x28   :  { %410 = vmatpush3.bf16.msra.mxu1 %v449_v11 }
  0x29   :  { %411 = vmatprep.subr.bf16.mxu1 %v504_v0  ;;  %426 = vmatpush3.bf16.msra.mxu0 %v455_v24 }
  0x2a   :  { %427 = vmatprep.subr.bf16.mxu0 %v504_v0 }
  0x2c   :  { %412 = vmatpush3.bf16.msra.mxu1 %v450_v12 }
  0x2d   :  { %428 = vmatpush3.bf16.msra.mxu0 %v456_v25 }
  0x2e   :  { %429 = vmatprep.subr.bf16.mxu0 %v504_v0 }
  0x31   :  { %430 = vmatpush3.bf16.msra.mxu0 %v457_v26 }
  0x32   :  { %431 = vmatprep.subr.bf16.mxu0 %v504_v0 }
  0x35   :  { %432 = vmatpush3.bf16.msra.mxu0 %v458_v27 }
  0xd7   :  { %v104_v18 = vpop.f32.mrf.mxu0 }
  0xd8   :  { %v105_v19 = vadd.f32 %v347_v17, %v104_v18 }
  0xd9   :  { %v395_v20 = vpop.f32.mrf.mxu0 }
  0xda   :  { %v110_v21 = vpack.c.bf16 %v105_v19, %v105_v19 }
  0xdb   :  { %v107_v22 = vpop.f32.mrf.mxu0 }
  0xdc   :  { %414 = vmatmul.mubr.bf16.vlgmr.msra.gmra.mxu1 %v110_v21 }
  0xdd   :  { %v396_v23 = vpop.f32.mrf.mxu0 }
 0x19c   :  { %v216_v29 = vpop.f32.mrf.mxu1 }
 0x19d   :  { %v217_v30 = vadd.f32 %v351_v28, %v216_v29 }
 0x19e   :  { %v415_v31 = vpop.f32.mrf.mxu1 }
 0x19f   :  { %v222_v32 = vmax.f32 %v217_v30, 0.0 }
 0x1a0   :  { %v219_v33 = vpop.f32.mrf.mxu1 }
 0x1a1   :  { %v223_v34 = vpack.c.bf16 %v222_v32, %v222_v32 }
 0x1a2   :  { %v416_v35 = vpop.f32.mrf.mxu1 }
 0x1a3   :  { %224 = vst [vmem:[#allocation2] sm:$0xf] %v223_v34 }
 0x1aa   :  { %v225_v36 = vld [vmem:[#allocation2] sm:$0xf] }
 0x1ab   :  { %434 = vmatmul.mubr.bf16.vlgmr.msra.gmra.mxu0 %v225_v36 }
 0x26b   :  { %v324_v37 = vpop.f32.mrf.mxu0 }
 0x26c   :  { %331 = vst.msk [vmem:[#allocation6] sm:$0xff] %vm330_vm2, %v324_v37 }
 0x26d   :  { %v435_v38 = vpop.f32.mrf.mxu0 }
 0x26e   :  { %490 = shalt.err (!%p487_p9)
}
 0x26f   :  { %341 = dma.vmem_to_hbm [thread:$0]  %s339_s13, 128, %s638_s6, [#allocation5]   ;;  %v327_v39 = vpop.f32.mrf.mxu0 }
 0x271   :  { %v436_v40 = vpop.f32.mrf.mxu0 }
 0x272   :  { %501 = dma.done.wait [#allocation5], 128  }
 0x273   :  { %502 = vsyncadd [#allocation5], 4294967168 }
 0x274   :  { %345 = vsyncpa [#allocation4], 1 }
 0x275   :  { %346 = vsyncpa [#allocation5], 1 }

// kernel: tpu_custom_call.1
= control target key start
LH: loop header
LB: loop body
LE: loop exit
PB: predicated region body
PF: predicated region fallthrough
CT: control target
= control target key end

     0   :  { %11 = vsyncpa [#allocation4], 0  ;;  %s632_s0 = inlined_call_operand.hbm [shape: f32[8,32], index: 0, kind: input, shape index: {}]   ;;  %s633_s1 = inlined_call_operand.vmem [shape: bf16[32,128], index: 1, kind: input, shape index: {}]   ;;  %s634_s2 = inlined_call_operand.vmem [shape: f32[1,128], index: 2, kind: input, shape index: {}]   ;;  %s635_s3 = inlined_call_operand.vmem [shape: bf16[128,128], index: 3, kind: input, shape index: {}]   ;;  %s636_s4 = inlined_call_operand.vmem [shape: f32[1,128], index: 4, kind: input, shape index: {}]   ;;  %s637_s5 = inlined_call_operand.vmem [shape: bf16[128,24], index: 5, kind: input, shape index: {}]   ;;  %s638_s6 = inlined_call_operand.hbm [shape: f32[8,24], index: 6, kind: output, shape index: {}]  }
   0x1   :  { %12 = vsyncpa [#allocation5], 0  ;;  %s503_s21 = smov [#allocation3]  }
   0x2   :  { %s19_s22 = sshll.u32 %s503_s21, 4  ;;  %s20_s22 = int_to_ptr.vmem [resolvable:$true] %s19_s22 }
   0x3   :  { %s467_s23 = scalar_lea.vmem %s20_s22, 128  ;;  %p472_p1 = scmp.lt.s32.totalorder %s20_s22, %s20_s22 }
   0x4   :  { %p468_p0 = scmp.ne.s32.totalorder %s20_s22, %s467_s23  ;;  %p473_p2 = scmp.lt.s32.totalorder %s467_s23, %s467_s23 }
   0x6   :  { %p474_p3 = por %p473_p2, %p472_p1 }
   0x8   :  { %p475_p4 = pnand %p474_p3, %p468_p0 }
   0xa   :  { %478 = shalt.err (!%p475_p4)
}
   0xb   :  { %22 = dma.hbm_to_vmem [thread:$0]  %s632_s0, 128, %s20_s22, [#allocation4]  }
   0xc   :  { %499 = dma.done.wait [#allocation4], 128  }
   0xd   :  { %500 = vsyncadd [#allocation4], 4294967168  ;;  %v504_v0 = vmov 0.0   ;;  %vm505_vm0 = vmmov 0   ;;  %v441_v1 = vld [vmem:[%s633_s1 + $0x8] sm:$0xff]   ;;  %v442_v2 = vld [vmem:[%s633_s1] sm:$0xff]  }
   0xe   :  { %389 = vmatprep.subr.bf16.mxu0 %v504_v0  ;;  %393 = vmatprep.mubr.msk.bf16.mxu0 %vm505_vm0, %v504_v0  ;;  %v41_v3 = vld [vmem:[#allocation3] sm:$0xff]  ;;  %v443_v4 = vld [vmem:[%s635_s3 + $0x38] sm:$0xff]   ;;  %v444_v6 = vld [vmem:[%s635_s3 + $0x30] sm:$0xff]   ;;  %vm66_vm1 = vcmask 261120   ;;  %s506_s12 = smov [#allocation6]   ;;  %vm330_vm2 = vcmask 195584  }
   0xf   :  { %397 = vmatprep.subr.bf16.mxu1 %v504_v0  ;;  %413 = vmatprep.mubr.msk.bf16.mxu1 %vm505_vm0, %v504_v0  ;;  %v42_v5 = vpack.c.bf16 %v41_v3, %v41_v3  ;;  %v445_v7 = vld [vmem:[%s635_s3 + $0x28] sm:$0xff]   ;;  %v446_v8 = vld [vmem:[%s635_s3 + $0x20] sm:$0xff]   ;;  %v447_v9 = vld [vmem:[%s635_s3 + $0x18] sm:$0xff]   ;;  %s338_s13 = sshll.u32 %s506_s12, 4  ;;  %s339_s13 = int_to_ptr.vmem [resolvable:$true] %s338_s13 }
  0x10   :  { %390 = vmatpush3.bf16.msra.mxu0 %v441_v1  ;;  %398 = vmatpush3.bf16.msra.mxu1 %v443_v4  ;;  %v448_v10 = vld [vmem:[%s635_s3 + $0x10] sm:$0xff]   ;;  %v449_v11 = vld [vmem:[%s635_s3 + $0x8] sm:$0xff]   ;;  %v450_v12 = vld [vmem:[%s635_s3] sm:$0xff]   ;;  %p484_p6 = scmp.lt.s32.totalorder %s339_s13, %s339_s13 }
  0x11   :  { %391 = vmatprep.subr.bf16.mxu0 %v504_v0  ;;  %399 = vmatprep.subr.bf16.mxu1 %v504_v0  ;;  %v451_v13 = vld [vmem:[%s637_s5 + $0x38] sm:$0xff]   ;;  %v452_v14 = vld [vmem:[%s637_s5 + $0x30] sm:$0xff]   ;;  %v453_v15 = vld [vmem:[%s637_s5 + $0x28] sm:$0xff]  }
  0x12   :  { %v454_v16 = vld [vmem:[%s637_s5 + $0x20] sm:$0xff]   ;;  %v455_v24 = vld [vmem:[%s637_s5 + $0x18] sm:$0xff]   ;;  %v456_v25 = vld [vmem:[%s637_s5 + $0x10] sm:$0xff]  }
  0x13   :  { %v347_v17 = vld [vmem:[%s634_s2] ss:$0 sm:$0xff]  ;;  %v457_v26 = vld [vmem:[%s637_s5 + $0x8] sm:$0xff]  }
  0x14   :  { %392 = vmatpush3.bf16.msra.mxu0 %v442_v2  ;;  %400 = vmatpush3.bf16.msra.mxu1 %v444_v6  ;;  %v458_v27 = vld [vmem:[%s637_s5] sm:$0xff]   ;;  %s479_s5 = scalar_lea.vmem %s339_s13, 128 }
  0x15   :  { %417 = vmatprep.subr.bf16.mxu0 %v504_v0  ;;  %401 = vmatprep.subr.bf16.mxu1 %v504_v0  ;;  %v351_v28 = vld [vmem:[%s636_s4] ss:$0 sm:$0xff]  ;;  %p480_p5 = scmp.ne.s32.totalorder %s339_s13, %s479_s5  ;;  %p485_p7 = scmp.lt.s32.totalorder %s479_s5, %s479_s5 }
  0x17   :  { %394 = vmatmul.mubr.msk.bf16.vlgmr.msra.gmra.mxu0 %vm66_vm1, %v42_v5  ;;  %p486_p8 = por %p485_p7, %p484_p6 }
  0x18   :  { %433 = vmatprep.mubr.msk.bf16.mxu0 %vm505_vm0, %v504_v0  ;;  %402 = vmatpush3.bf16.msra.mxu1 %v445_v7 }
  0x19   :  { %403 = vmatprep.subr.bf16.mxu1 %v504_v0  ;;  %418 = vmatpush3.bf16.msra.mxu0 %v451_v13  ;;  %p487_p9 = pnand %p486_p8, %p480_p5 }
  0x1a   :  { %419 = vmatprep.subr.bf16.mxu0 %v504_v0 }
  0x1c   :  { %404 = vmatpush3.bf16.msra.mxu1 %v446_v8 }
  0x1d   :  { %405 = vmatprep.subr.bf16.mxu1 %v504_v0  ;;  %420 = vmatpush3.bf16.msra.mxu0 %v452_v14 }
  0x1e   :  { %421 = vmatprep.subr.bf16.mxu0 %v504_v0 }
  0x20   :  { %406 = vmatpush3.bf16.msra.mxu1 %v447_v9 }
  0x21   :  { %407 = vmatprep.subr.bf16.mxu1 %v504_v0  ;;  %422 = vmatpush3.bf16.msra.mxu0 %v453_v15 }
  0x22   :  { %423 = vmatprep.subr.bf16.mxu0 %v504_v0 }
  0x24   :  { %408 = vmatpush3.bf16.msra.mxu1 %v448_v10 }
  0x25   :  { %409 = vmatprep.subr.bf16.mxu1 %v504_v0  ;;  %424 = vmatpush3.bf16.msra.mxu0 %v454_v16 }
  0x26   :  { %425 = vmatprep.subr.bf16.mxu0 %v504_v0 }
  0x28   :  { %410 = vmatpush3.bf16.msra.mxu1 %v449_v11 }
  0x29   :  { %411 = vmatprep.subr.bf16.mxu1 %v504_v0  ;;  %426 = vmatpush3.bf16.msra.mxu0 %v455_v24 }
  0x2a   :  { %427 = vmatprep.subr.bf16.mxu0 %v504_v0 }
  0x2c   :  { %412 = vmatpush3.bf16.msra.mxu1 %v450_v12 }
  0x2d   :  { %428 = vmatpush3.bf16.msra.mxu0 %v456_v25 }
  0x2e   :  { %429 = vmatprep.subr.bf16.mxu0 %v504_v0 }
  0x31   :  { %430 = vmatpush3.bf16.msra.mxu0 %v457_v26 }
  0x32   :  { %431 = vmatprep.subr.bf16.mxu0 %v504_v0 }
  0x35   :  { %432 = vmatpush3.bf16.msra.mxu0 %v458_v27 }
  0xd7   :  { %v104_v18 = vpop.f32.mrf.mxu0 }
  0xd8   :  { %v105_v19 = vadd.f32 %v347_v17, %v104_v18 }
  0xd9   :  { %v395_v20 = vpop.f32.mrf.mxu0 }
  0xda   :  { %v110_v21 = vpack.c.bf16 %v105_v19, %v105_v19 }
  0xdb   :  { %v107_v22 = vpop.f32.mrf.mxu0 }
  0xdc   :  { %414 = vmatmul.mubr.bf16.vlgmr.msra.gmra.mxu1 %v110_v21 }
  0xdd   :  { %v396_v23 = vpop.f32.mrf.mxu0 }
 0x19c   :  { %v216_v29 = vpop.f32.mrf.mxu1 }
 0x19d   :  { %v217_v30 = vadd.f32 %v351_v28, %v216_v29 }
 0x19e   :  { %v415_v31 = vpop.f32.mrf.mxu1 }
 0x19f   :  { %v222_v32 = vmax.f32 %v217_v30, 0.0 }
 0x1a0   :  { %v219_v33 = vpop.f32.mrf.mxu1 }
 0x1a1   :  { %v223_v34 = vpack.c.bf16 %v222_v32, %v222_v32 }
 0x1a2   :  { %v416_v35 = vpop.f32.mrf.mxu1 }
 0x1a3   :  { %224 = vst [vmem:[#allocation2] sm:$0xf] %v223_v34 }
 0x1aa   :  { %v225_v36 = vld [vmem:[#allocation2] sm:$0xf] }
 0x1ab   :  { %434 = vmatmul.mubr.bf16.vlgmr.msra.gmra.mxu0 %v225_v36 }
 0x26b   :  { %v324_v37 = vpop.f32.mrf.mxu0 }
 0x26c   :  { %331 = vst.msk [vmem:[#allocation6] sm:$0xff] %vm330_vm2, %v324_v37 }
 0x26d   :  { %v435_v38 = vpop.f32.mrf.mxu0 }
 0x26e   :  { %490 = shalt.err (!%p487_p9)
}
 0x26f   :  { %341 = dma.vmem_to_hbm [thread:$0]  %s339_s13, 128, %s638_s6, [#allocation5]   ;;  %v327_v39 = vpop.f32.mrf.mxu0 }
 0x271   :  { %v436_v40 = vpop.f32.mrf.mxu0 }
 0x272   :  { %501 = dma.done.wait [#allocation5], 128  }
 0x273   :  { %502 = vsyncadd [#allocation5], 4294967168 }
 0x274   :  { %345 = vsyncpa [#allocation4], 1 }
 0x275   :  { %346 = vsyncpa [#allocation5], 1 }

</bundles_post_ra>
